<compile_context>
chip_gen: v5e
topology: v5e:2x2
jax: 0.10.0
libtpu: 0.0.40
codegen_flags: <defaults>
</compile_context>

<pallas_src>
import jax
import jax.numpy as jnp
from jax.experimental import pallas as pl
from jax.experimental.pallas import tpu as pltpu

LANE = 128     # lane width  (last dim)
SUBLANE = 8    # sublane width (second-to-last dim)


def _round_up(x, m):
    return (x + m - 1) // m * m


def mlp_kernel(x_ref, w1_ref, b1_ref, w2_ref, b2_ref, w3_ref, b3_ref, o_ref):
    # fc1 + ReLU  (bf16 MXU operands, f32 accumulation, f32 elementwise)
    h = jnp.dot(x_ref[...].astype(jnp.bfloat16), w1_ref[...],
                preferred_element_type=jnp.float32)
    h = jnp.maximum(h + b1_ref[...], 0.0)
    # fc2 + ReLU
    h = jnp.dot(h.astype(jnp.bfloat16), w2_ref[...],
                preferred_element_type=jnp.float32)
    h = jnp.maximum(h + b2_ref[...], 0.0)
    # fc3 + Tanh
    h = jnp.dot(h.astype(jnp.bfloat16), w3_ref[...],
                preferred_element_type=jnp.float32)
    o_ref[...] = jnp.tanh(h + b3_ref[...]).astype(o_ref.dtype)


def mlp_forward(x, w1, b1, w2, b2, w3, b3, *, block_m=512):
    """x: (B, in); weights pre-transposed to (in, out); biases (1, out).  Returns (B, out) f32."""
    batch, in_f = x.shape
    hid_f = w1.shape[1]
    out_f = w3.shape[1]

    # --- pad feature dims to full 128-lane slabs, batch to a multiple of the tile ---
    in_p = _round_up(in_f, LANE)
    hid_p = _round_up(hid_f, LANE)
    out_p = _round_up(out_f, LANE)
    tm = min(block_m, _round_up(batch, SUBLANE))
    b_pad = _round_up(batch, tm)

    xp = jnp.pad(x.astype(jnp.float32), ((0, b_pad - batch), (0, in_p - in_f)))
    w1p = jnp.pad(w1, ((0, in_p - in_f), (0, hid_p - hid_f))).astype(jnp.bfloat16)
    w2p = jnp.pad(w2, ((0, hid_p - hid_f), (0, hid_p - hid_f))).astype(jnp.bfloat16)
    w3p = jnp.pad(w3, ((0, hid_p - hid_f), (0, out_p - out_f))).astype(jnp.bfloat16)
    b1p = jnp.pad(b1.astype(jnp.float32), ((0, 0), (0, hid_p - hid_f)))
    b2p = jnp.pad(b2.astype(jnp.float32), ((0, 0), (0, hid_p - hid_f)))
    b3p = jnp.pad(b3.astype(jnp.float32), ((0, 0), (0, out_p - out_f)))

    grid = (b_pad // tm,)

    # --- VMEM budget: double-buffered x/out tiles + resident weights/biases + f32 intermediates ---
    vmem_bytes = (
        2 * tm * in_p * 4            # x tile, 2 buffers (f32)
        + 2 * tm * out_p * 4         # out tile, 2 buffers (f32)
        + (in_p * hid_p + hid_p * hid_p + hid_p * out_p) * 2   # bf16 weights
        + (2 * hid_p + out_p) * 4    # biases
        + 2 * tm * hid_p * 4         # intermediate activation headroom
    )
    vmem_limit = int(min(max(2 * vmem_bytes, 16 * 1024 * 1024), 48 * 1024 * 1024))

    flops = 2 * b_pad * (in_p * hid_p + hid_p * hid_p + hid_p * out_p)
    bytes_accessed = (
        b_pad * in_p * 4 + b_pad * out_p * 4
        + (in_p * hid_p + hid_p * hid_p + hid_p * out_p) * 2
        + (2 * hid_p + out_p) * 4
    )
    cost = pl.CostEstimate(flops=flops, transcendentals=b_pad * out_p,
                           bytes_accessed=bytes_accessed)

    out_padded = pl.pallas_call(
        mlp_kernel,
        out_shape=jax.ShapeDtypeStruct((b_pad, out_p), jnp.float32),
        grid=grid,
        in_specs=[
            pl.BlockSpec((tm, in_p), lambda i: (i, 0)),     # x: tiled over batch
            pl.BlockSpec((in_p, hid_p), lambda i: (0, 0)),  # w1: resident
            pl.BlockSpec((1, hid_p), lambda i: (0, 0)),     # b1
            pl.BlockSpec((hid_p, hid_p), lambda i: (0, 0)),  # w2
            pl.BlockSpec((1, hid_p), lambda i: (0, 0)),     # b2
            pl.BlockSpec((hid_p, out_p), lambda i: (0, 0)),  # w3
            pl.BlockSpec((1, out_p), lambda i: (0, 0)),     # b3
        ],
        out_specs=pl.BlockSpec((tm, out_p), lambda i: (i, 0)),
        compiler_params=pltpu.CompilerParams(
            dimension_semantics=("parallel",),
            vmem_limit_bytes=vmem_limit,
        ),
        cost_estimate=cost,
    )(xp, w1p, b1p, w2p, b2p, w3p, b3p)

    return out_padded[:batch, :out_f]


def init_params(key, input_size, hidden_size, output_size):
    """Deterministic init mimicking torch.nn.Linear (uniform +- 1/sqrt(fan_in)).

    Weights are returned already transposed to (in_features, out_features).
    """
    ks = jax.random.split(key, 6)

    def linear(kw, kb, fan_in, fan_out):
        bound = 1.0 / jnp.sqrt(fan_in)
        w = jax.random.uniform(kw, (fan_in, fan_out), jnp.float32, -bound, bound)
        b = jax.random.uniform(kb, (1, fan_out), jnp.float32, -bound, bound)
        return w, b

    w1, b1 = linear(ks[0], ks[1], input_size, hidden_size)
    w2, b2 = linear(ks[2], ks[3], hidden_size, hidden_size)
    w3, b3 = linear(ks[4], ks[5], hidden_size, output_size)
    return w1, b1, w2, b2, w3, b3


if __name__ == "__main__":
    # Small shapes consistent with the module's forward: x is (batch, input_size).
    batch, input_size, hidden_size, output_size = 8, 16, 40, 8

    key = jax.random.PRNGKey(0)
    k_x, k_p = jax.random.split(key)
    x = jax.random.normal(k_x, (batch, input_size), dtype=jnp.float32)
    params = init_params(k_p, input_size, hidden_size, output_size)

    out = mlp_forward(x, *params)
    jax.block_until_ready(out)
    assert out.shape == (batch, output_size)

    # Reference check in plain f32 JAX (kernel uses bf16 MXU operands -> loose tolerance).
    w1, b1, w2, b2, w3, b3 = params
    ref = jnp.maximum(x @ w1 + b1, 0.0)
    ref = jnp.maximum(ref @ w2 + b2, 0.0)
    ref = jnp.tanh(ref @ w3 + b3)
    assert jnp.allclose(out, ref, atol=2e-2, rtol=2e-2), "mismatch vs reference"

    print("KERNEL_OK")
</pallas_src>

<mosaic_0001>
module attributes {stable_mosaic.version = 11 : i64} {
  func.func @mlp_kernel(%arg0: i32, %arg1: memref<8x128xf32, #tpu.memory_space<vmem>>, %arg2: memref<128x128xbf16, #tpu.memory_space<vmem>>, %arg3: memref<1x128xf32, #tpu.memory_space<vmem>>, %arg4: memref<128x128xbf16, #tpu.memory_space<vmem>>, %arg5: memref<1x128xf32, #tpu.memory_space<vmem>>, %arg6: memref<128x128xbf16, #tpu.memory_space<vmem>>, %arg7: memref<1x128xf32, #tpu.memory_space<vmem>>, %arg8: memref<8x128xf32, #tpu.memory_space<vmem>>) attributes {dimension_semantics = [#tpu.dimension_semantics<parallel>], iteration_bounds = array<i64: 1>, scalar_prefetch = 0 : i64, scratch_operands = 0 : i64, tpu.core_type = #tpu.core_type<tc>, window_params = [{transform_indices = @transform_0, window_bounds = array<i64: 8, 128>}, {pipeline_mode = #tpu.pipeline_mode<synchronous>, transform_indices = @transform_1, window_bounds = array<i64: 128, 128>}, {pipeline_mode = #tpu.pipeline_mode<synchronous>, transform_indices = @transform_2, window_bounds = array<i64: 1, 128>}, {pipeline_mode = #tpu.pipeline_mode<synchronous>, transform_indices = @transform_3, window_bounds = array<i64: 128, 128>}, {pipeline_mode = #tpu.pipeline_mode<synchronous>, transform_indices = @transform_4, window_bounds = array<i64: 1, 128>}, {pipeline_mode = #tpu.pipeline_mode<synchronous>, transform_indices = @transform_5, window_bounds = array<i64: 128, 128>}, {pipeline_mode = #tpu.pipeline_mode<synchronous>, transform_indices = @transform_6, window_bounds = array<i64: 1, 128>}, {transform_indices = @transform_7, window_bounds = array<i64: 8, 128>}]} {
    %c0 = arith.constant 0 : index
    %c0_0 = arith.constant 0 : index
    %0 = vector.load %arg1[%c0, %c0_0] : memref<8x128xf32, #tpu.memory_space<vmem>>, vector<8x128xf32>
    %1 = arith.truncf %0 : vector<8x128xf32> to vector<8x128xbf16>
    %c0_1 = arith.constant 0 : index
    %c0_2 = arith.constant 0 : index
    %2 = vector.load %arg2[%c0_1, %c0_2] : memref<128x128xbf16, #tpu.memory_space<vmem>>, vector<128x128xbf16>
    %cst = arith.constant dense<0.000000e+00> : vector<8x128xf32>
    %3 = tpu.matmul %1, %2, %cst {dimension_numbers = #tpu.dot_dimension_numbers<[1], [0], [0], [1], [0, 0, 1, 1], [], []>} : vector<8x128xbf16>, vector<128x128xbf16>, vector<8x128xf32> -> vector<8x128xf32>
    %c0_3 = arith.constant 0 : index
    %c0_4 = arith.constant 0 : index
    %4 = vector.load %arg3[%c0_3, %c0_4] : memref<1x128xf32, #tpu.memory_space<vmem>>, vector<1x128xf32>
    %5 = vector.broadcast %4 : vector<1x128xf32> to vector<8x128xf32>
    %6 = arith.addf %3, %5 : vector<8x128xf32>
    %cst_5 = arith.constant 0.000000e+00 : f32
    %7 = vector.broadcast %cst_5 : f32 to vector<8x128xf32>
    %8 = arith.maximumf %6, %7 : vector<8x128xf32>
    %9 = arith.truncf %8 : vector<8x128xf32> to vector<8x128xbf16>
    %c0_6 = arith.constant 0 : index
    %c0_7 = arith.constant 0 : index
    %10 = vector.load %arg4[%c0_6, %c0_7] : memref<128x128xbf16, #tpu.memory_space<vmem>>, vector<128x128xbf16>
    %cst_8 = arith.constant dense<0.000000e+00> : vector<8x128xf32>
    %11 = tpu.matmul %9, %10, %cst_8 {dimension_numbers = #tpu.dot_dimension_numbers<[1], [0], [0], [1], [0, 0, 1, 1], [], []>} : vector<8x128xbf16>, vector<128x128xbf16>, vector<8x128xf32> -> vector<8x128xf32>
    %c0_9 = arith.constant 0 : index
    %c0_10 = arith.constant 0 : index
    %12 = vector.load %arg5[%c0_9, %c0_10] : memref<1x128xf32, #tpu.memory_space<vmem>>, vector<1x128xf32>
    %13 = vector.broadcast %12 : vector<1x128xf32> to vector<8x128xf32>
    %14 = arith.addf %11, %13 : vector<8x128xf32>
    %cst_11 = arith.constant 0.000000e+00 : f32
    %15 = vector.broadcast %cst_11 : f32 to vector<8x128xf32>
    %16 = arith.maximumf %14, %15 : vector<8x128xf32>
    %17 = arith.truncf %16 : vector<8x128xf32> to vector<8x128xbf16>
    %c0_12 = arith.constant 0 : index
    %c0_13 = arith.constant 0 : index
    %18 = vector.load %arg6[%c0_12, %c0_13] : memref<128x128xbf16, #tpu.memory_space<vmem>>, vector<128x128xbf16>
    %cst_14 = arith.constant dense<0.000000e+00> : vector<8x128xf32>
    %19 = tpu.matmul %17, %18, %cst_14 {dimension_numbers = #tpu.dot_dimension_numbers<[1], [0], [0], [1], [0, 0, 1, 1], [], []>} : vector<8x128xbf16>, vector<128x128xbf16>, vector<8x128xf32> -> vector<8x128xf32>
    %c0_15 = arith.constant 0 : index
    %c0_16 = arith.constant 0 : index
    %20 = vector.load %arg7[%c0_15, %c0_16] : memref<1x128xf32, #tpu.memory_space<vmem>>, vector<1x128xf32>
    %21 = vector.broadcast %20 : vector<1x128xf32> to vector<8x128xf32>
    %22 = arith.addf %19, %21 : vector<8x128xf32>
    %23 = math.tanh %22 : vector<8x128xf32>
    %c0_17 = arith.constant 0 : index
    %c0_18 = arith.constant 0 : index
    %24 = vector.load %arg8[%c0_17, %c0_18] : memref<8x128xf32, #tpu.memory_space<vmem>>, vector<8x128xf32>
    tpu.vector_store %arg8[%c0_17, %c0_18], %23 {strides = array<i32>} : memref<8x128xf32, #tpu.memory_space<vmem>>, vector<8x128xf32>,
    return
  }
  func.func @transform_0(%arg0: i32) -> (i32, i32) {
    %c0_i32 = arith.constant 0 : i32
    %c0_i32_0 = arith.constant 0 : i32
    return %arg0, %c0_i32 : i32, i32
  }
  func.func @transform_1(%arg0: i32) -> (i32, i32) {
    %c0_i32 = arith.constant 0 : i32
    %c0_i32_0 = arith.constant 0 : i32
    %c0_i32_1 = arith.constant 0 : i32
    return %c0_i32, %c0_i32_0 : i32, i32
  }
  func.func @transform_2(%arg0: i32) -> (i32, i32) {
    %c0_i32 = arith.constant 0 : i32
    %c0_i32_0 = arith.constant 0 : i32
    %c0_i32_1 = arith.constant 0 : i32
    return %c0_i32, %c0_i32_0 : i32, i32
  }
  func.func @transform_3(%arg0: i32) -> (i32, i32) {
    %c0_i32 = arith.constant 0 : i32
    %c0_i32_0 = arith.constant 0 : i32
    %c0_i32_1 = arith.constant 0 : i32
    return %c0_i32, %c0_i32_0 : i32, i32
  }
  func.func @transform_4(%arg0: i32) -> (i32, i32) {
    %c0_i32 = arith.constant 0 : i32
    %c0_i32_0 = arith.constant 0 : i32
    %c0_i32_1 = arith.constant 0 : i32
    return %c0_i32, %c0_i32_0 : i32, i32
  }
  func.func @transform_5(%arg0: i32) -> (i32, i32) {
    %c0_i32 = arith.constant 0 : i32
    %c0_i32_0 = arith.constant 0 : i32
    %c0_i32_1 = arith.constant 0 : i32
    return %c0_i32, %c0_i32_0 : i32, i32
  }
  func.func @transform_6(%arg0: i32) -> (i32, i32) {
    %c0_i32 = arith.constant 0 : i32
    %c0_i32_0 = arith.constant 0 : i32
    %c0_i32_1 = arith.constant 0 : i32
    return %c0_i32, %c0_i32_0 : i32, i32
  }
  func.func @transform_7(%arg0: i32) -> (i32, i32) {
    %c0_i32 = arith.constant 0 : i32
    %c0_i32_0 = arith.constant 0 : i32
    return %arg0, %c0_i32 : i32, i32
  }
}

</mosaic_0001>

<bundles_post_ra>
// kernel: tpu_custom_call.1
= control target key start
LH: loop header
LB: loop body
LE: loop exit
PB: predicated region body
PF: predicated region fallthrough
CT: control target
= control target key end

     0   :  { %12 = vsyncpa [#allocation3], 0  ;;  %s689_s0 = inlined_call_operand.hbm [shape: f32[8,128], index: 0, kind: input, shape index: {}]   ;;  %s690_s1 = inlined_call_operand.hbm [shape: bf16[128,128], index: 1, kind: input, shape index: {}]   ;;  %s691_s2 = inlined_call_operand.vmem [shape: f32[1,128], index: 2, kind: input, shape index: {}]   ;;  %s692_s3 = inlined_call_operand.hbm [shape: bf16[128,128], index: 3, kind: input, shape index: {}]   ;;  %s693_s4 = inlined_call_operand.vmem [shape: f32[1,128], index: 4, kind: input, shape index: {}]   ;;  %s694_s5 = inlined_call_operand.hbm [shape: bf16[128,128], index: 5, kind: input, shape index: {}]   ;;  %s695_s6 = inlined_call_operand.vmem [shape: f32[1,128], index: 6, kind: input, shape index: {}]   ;;  %s696_s7 = inlined_call_operand.hbm [shape: f32[8,128], index: 7, kind: output, shape index: {}]  }
   0x1   :  { %13 = vsyncpa [#allocation6], 0 }
   0x2   :  { %14 = vsyncpa [#allocation9], 0  ;;  %s31_s26 = sshll.u32 %s690_s1, 4  ;;  %s32_s26 = int_to_ptr.hbm [resolvable:$true] %s31_s26 }
   0x3   :  { %15 = vsyncpa [#allocation4], 0  ;;  %s618_s27 = smov [#allocation5]   ;;  %s21_s8 = sshll.u32 %s689_s0, 4  ;;  %s22_s8 = int_to_ptr.hbm [resolvable:$true] %s21_s8 }
   0x4   :  { %s33_s28 = sshll.u32 %s618_s27, 4  ;;  %s619_s9 = smov 64   ;;  %s34_s28 = int_to_ptr.vmem [resolvable:$true] %s33_s28 }
   0x5   :  { %s620_s10 = smov 4   ;;  %s621_s11 = smov [#allocation2]  }
   0x6   :  { %39 = dma.hbm_to_vmem [thread:$0]  %s32_s26, 1024, %s34_s28, [#allocation6], %s619_s9, %s619_s9, %s620_s10  }
   0x7   :  { %s23_s12 = sshll.u32 %s621_s11, 4  ;;  %s46_s15 = sshll.u32 %s692_s3, 4  ;;  %s24_s12 = int_to_ptr.vmem [resolvable:$true] %s23_s12  ;;  %s47_s15 = int_to_ptr.hbm [resolvable:$true] %s46_s15 }
   0x8   :  { %26 = dma.hbm_to_vmem [thread:$0]  %s22_s8, 128, %s24_s12, [#allocation3]  }
   0x9   :  { %s61_s17 = sshll.u32 %s694_s5, 4  ;;  %s622_s18 = smov [#allocation7]   ;;  %s62_s17 = int_to_ptr.hbm [resolvable:$true] %s61_s17 }
   0xa   :  { %s48_s19 = sshll.u32 %s622_s18, 4  ;;  %s623_s0 = smov [#allocation8]   ;;  %s49_s19 = int_to_ptr.vmem [resolvable:$true] %s48_s19 }
   0xb   :  { %54 = dma.hbm_to_vmem [thread:$0]  %s47_s15, 1024, %s49_s19, [#allocation6], %s619_s9, %s619_s9, %s620_s10  }
   0xc   :  { %s63_s20 = sshll.u32 %s623_s0, 4  ;;  %s64_s20 = int_to_ptr.vmem [resolvable:$true] %s63_s20 }
   0xd   :  { %69 = dma.hbm_to_vmem [thread:$0]  %s62_s17, 1024, %s64_s20, [#allocation9], %s619_s9, %s619_s9, %s620_s10  }
   0xe   :  { %610 = dma.done.wait [#allocation3], 128  }
   0xf   :  { %611 = vsyncadd [#allocation3], 4294967168 }
  0x10   :  { %612 = dma.done.wait [#allocation6], 2048  }
  0x11   :  { %613 = vsyncadd [#allocation6], 4294965248 }
  0x12   :  { %614 = dma.done.wait [#allocation9], 1024  }
  0x13   :  { %615 = vsyncadd [#allocation9], 4294966272  ;;  %v461_v0 = vld [vmem:[#allocation5 + $0x38] sm:$0xff]  ;;  %v460_v1 = vld [vmem:[#allocation5 + $0x30] sm:$0xff]  ;;  %s624_s24 = smov [#allocation10]   ;;  %s346_s28 = sshll.u32 %s696_s7, 4  ;;  %s347_s28 = int_to_ptr.hbm [resolvable:$true] %s346_s28 }
  0x14   :  { %158 = vmatpush.bf16.msra.mxu0 %v461_v0  ;;  %v469_v2 = vld [vmem:[#allocation7 + $0x38] sm:$0xff]  ;;  %v468_v3 = vld [vmem:[#allocation7 + $0x30] sm:$0xff]  ;;  %v459_v4 = vld [vmem:[#allocation5 + $0x28] sm:$0xff]  ;;  %s344_s25 = sshll.u32 %s624_s24, 4  ;;  %s345_s25 = int_to_ptr.vmem [resolvable:$true] %s344_s25 }
  0x15   :  { %241 = vmatpush.bf16.msra.mxu1 %v469_v2  ;;  %v467_v5 = vld [vmem:[#allocation7 + $0x28] sm:$0xff]  ;;  %v458_v6 = vld [vmem:[#allocation5 + $0x20] sm:$0xff]  ;;  %v457_v8 = vld [vmem:[#allocation5 + $0x18] sm:$0xff] }
  0x16   :  { %v466_v7 = vld [vmem:[#allocation7 + $0x20] sm:$0xff]  ;;  %v465_v9 = vld [vmem:[#allocation7 + $0x18] sm:$0xff]  ;;  %v456_v10 = vld [vmem:[#allocation5 + $0x10] sm:$0xff] }
  0x17   :  { %v464_v11 = vld [vmem:[#allocation7 + $0x10] sm:$0xff]  ;;  %v455_v12 = vld [vmem:[#allocation5 + $0x8] sm:$0xff]  ;;  %v454_v13 = vld [vmem:[#allocation5] sm:$0xff] }
  0x18   :  { %159 = vmatpush.bf16.msra.mxu0 %v460_v1  ;;  %v88_v14 = vld [vmem:[#allocation2] sm:$0xff]  ;;  %v463_v16 = vld [vmem:[#allocation7 + $0x8] sm:$0xff]  ;;  %v462_v17 = vld [vmem:[#allocation7] sm:$0xff] }
  0x19   :  { %242 = vmatpush.bf16.msra.mxu1 %v468_v3  ;;  %v89_v15 = vpack.c.bf16 %v88_v14, %v88_v14  ;;  %v477_v18 = vld [vmem:[#allocation8 + $0x38] sm:$0xff]  ;;  %v476_v19 = vld [vmem:[#allocation8 + $0x30] sm:$0xff]  ;;  %v475_v20 = vld [vmem:[#allocation8 + $0x28] sm:$0xff] }
  0x1a   :  { %324 = vmatpush.bf16.msra.mxu2 %v477_v18  ;;  %v474_v21 = vld [vmem:[#allocation8 + $0x20] sm:$0xff]  ;;  %v473_v22 = vld [vmem:[#allocation8 + $0x18] sm:$0xff]  ;;  %v472_v23 = vld [vmem:[#allocation8 + $0x10] sm:$0xff] }
  0x1b   :  { %v485_v24 = vld [vmem:[%s691_s2] ss:$0 sm:$0xff]  ;;  %v471_v30 = vld [vmem:[#allocation8 + $0x8] sm:$0xff]  ;;  %v470_v31 = vld [vmem:[#allocation8] sm:$0xff] }
  0x1c   :  { %160 = vmatpush.bf16.msra.mxu0 %v459_v4  ;;  %v486_v32 = vld [vmem:[%s693_s4] ss:$0 sm:$0xff] }
  0x1d   :  { %243 = vmatpush.bf16.msra.mxu1 %v467_v5  ;;  %v487_v38 = vld [vmem:[%s695_s6] ss:$0 sm:$0xff] }
  0x1e   :  { %325 = vmatpush.bf16.msra.mxu2 %v476_v19 }
  0x20   :  { %161 = vmatpush.bf16.msra.mxu0 %v458_v6 }
  0x21   :  { %244 = vmatpush.bf16.msra.mxu1 %v466_v7 }
  0x22   :  { %326 = vmatpush.bf16.msra.mxu2 %v475_v20 }
  0x24   :  { %162 = vmatpush.bf16.msra.mxu0 %v457_v8 }
  0x25   :  { %245 = vmatpush.bf16.msra.mxu1 %v465_v9 }
  0x26   :  { %327 = vmatpush.bf16.msra.mxu2 %v474_v21 }
  0x28   :  { %163 = vmatpush.bf16.msra.mxu0 %v456_v10 }
  0x29   :  { %246 = vmatpush.bf16.msra.mxu1 %v464_v11 }
  0x2a   :  { %328 = vmatpush.bf16.msra.mxu2 %v473_v22 }
  0x2c   :  { %164 = vmatpush.bf16.msra.mxu0 %v455_v12 }
  0x2d   :  { %247 = vmatpush.bf16.msra.mxu1 %v463_v16 }
  0x2e   :  { %329 = vmatpush.bf16.msra.mxu2 %v472_v23 }
  0x30   :  { %165 = vmatpush.bf16.msra.mxu0 %v454_v13 }
  0x31   :  { %248 = vmatpush.bf16.msra.mxu1 %v462_v17 }
  0x32   :  { %330 = vmatpush.bf16.msra.mxu2 %v471_v30 }
  0x33   :  { %166 = vmatmul.bf16.vlgmr.msra.gmra.mxu0 %v89_v15 }
  0x36   :  { %331 = vmatpush.bf16.msra.mxu2 %v470_v31 }
  0xb0   :  { %v167_v25 = vpop.f32.mrf.mxu0 }
  0xb1   :  { %v168_v26 = vadd.f32 %v485_v24, %v167_v25 }
  0xb3   :  { %v171_v27 = vmax.f32 %v168_v26, 0.0 }
  0xb5   :  { %v172_v28 = vpack.c.bf16 %v171_v27, %v171_v27 }
  0xb7   :  { %249 = vmatmul.bf16.vlgmr.msra.gmra.mxu1 %v172_v28 }
  0xb8   :  { %v169_v29 = vpop.f32.mrf.mxu0 }
 0x134   :  { %v250_v33 = vpop.f32.mrf.mxu1 }
 0x135   :  { %v251_v34 = vadd.f32 %v486_v32, %v250_v33 }
 0x137   :  { %v254_v35 = vmax.f32 %v251_v34, 0.0 }
 0x139   :  { %v255_v36 = vpack.c.bf16 %v254_v35, %v254_v35 }
 0x13b   :  { %332 = vmatmul.bf16.vlgmr.msra.gmra.mxu2 %v255_v36 }
 0x13c   :  { %v252_v37 = vpop.f32.mrf.mxu1 }
 0x1be   :  { %v333_v39 = vpop.f32.mrf.mxu2 }
 0x1bf   :  { %v334_v40 = vadd.f32 %v487_v38, %v333_v39 }
 0x1c1   :  { %488 = vtanh.f32 %v334_v40 }
 0x1c6   :  { %v335_v41 = vpop.f32.mrf.mxu2 }
 0x1c7   :  { %v489_v42 = vpop.eup %488 }
 0x1c8   :  { %338 = vst [vmem:[#allocation10] sm:$0xff] %v489_v42 }
 0x1c9   :  { %349 = dma.vmem_to_hbm [thread:$0]  %s345_s25, 128, %s347_s28, [#allocation4]  }
 0x1ca   :  { %616 = dma.done.wait [#allocation4], 128  }
 0x1cb   :  { %617 = vsyncadd [#allocation4], 4294967168 }
 0x1cc   :  { %354 = vsyncpa [#allocation3], 1 }
 0x1cd   :  { %355 = vsyncpa [#allocation6], 1 }
 0x1ce   :  { %356 = vsyncpa [#allocation9], 1 }
 0x1cf   :  { %357 = vsyncpa [#allocation4], 1 }

</bundles_post_ra>
